<compile_context>
chip_gen: v6e
topology: v6e:2x2x1
jax: 0.10.0
libtpu: 0.0.40
codegen_flags: <defaults>
</compile_context>

<pallas_src>
import math

import jax
import jax.numpy as jnp
from jax import lax
from jax.experimental import pallas as pl
from jax.experimental.pallas import tpu as pltpu


_SEQ_TILE_CAP = 256          # sized for v7x (64 MiB VMEM); also fine on v5e/v6e
_VMEM_LIMIT = 32 * 1024 * 1024


def _pick_seq_tile(s, cap=_SEQ_TILE_CAP):
    """Largest tile <= cap that divides S and satisfies TPU (8,128) tiling."""
    if s <= cap:
        return s
    t = (cap // 128) * 128
    while t >= 128:
        if s % t == 0:
            return t
        t -= 128
    return s                 # fallback: no tiling (full-dim block is always legal)


# ---------------------------------------------------------------------------
# Kernel 1: fused QKV projection.  One (tq, D) @ (D, 3D) matmul per tile.
# ---------------------------------------------------------------------------
def _qkv_kernel(x_ref, w_ref, o_ref):
    d = x_ref.shape[-1]
    res = jnp.dot(x_ref[...], w_ref[...], preferred_element_type=jnp.float32)
    o_ref[0] = res[:, :d].astype(o_ref.dtype)          # Q
    o_ref[1] = res[:, d:2 * d].astype(o_ref.dtype)      # K
    o_ref[2] = res[:, 2 * d:].astype(o_ref.dtype)       # V


# ---------------------------------------------------------------------------
# Kernel 2: tiled attention + pairwise-geometry MLP biases (online softmax).
# ---------------------------------------------------------------------------
def _attn_kernel(q_ref, k_ref, v_ref,
                 cqx_ref, cqy_ref, ckx_ref, cky_ref,
                 w1r_ref, b1r_ref, w2r_ref,
                 w1t_ref, b1t_ref, w2t_ref,
                 b2_ref,
                 o_ref,
                 m_s, l_s, acc_s):
    ki = pl.program_id(2)
    nk = pl.num_programs(2)

    @pl.when(ki == 0)
    def _init():
        m_s[...] = jnp.full_like(m_s, -jnp.inf)
        l_s[...] = jnp.zeros_like(l_s)
        acc_s[...] = jnp.zeros_like(acc_s)

    q = q_ref[...]                                  # (tq, D)
    k = k_ref[...]                                  # (tk, D)
    v = v_ref[...]                                  # (tk, D)
    inv_scale = 1.0 / math.sqrt(q.shape[-1])

    # scores = Q K^T / sqrt(d)  (single MXU matmul, f32 accumulation)
    s = lax.dot_general(q, k, (((1,), (1,)), ((), ())),
                        preferred_element_type=jnp.float32) * inv_scale

    # ---- pairwise geometry for this (tq, tk) tile (all f32, lane-dense) ----
    cqx = cqx_ref[...]                              # (tq, 1)  coords_i
    cqy = cqy_ref[...]
    ckx = ckx_ref[...]                              # (1, tk)  coords_j
    cky = cky_ref[...]
    dx = ckx - cqx                                  # (tq, tk): x_j - x_i
    dy = cky - cqy
    r2 = dx * dx + dy * dy
    dist = jnp.sqrt(r2 + 1e-8)
    nz = r2 > 0.0
    inv_r = lax.rsqrt(jnp.where(nz, r2, 1.0))       # one EUP rsqrt, no divides
    sin_t = jnp.where(nz, dy * inv_r, 0.0)          # sin(atan2(dy, dx))
    cos_t = jnp.where(nz, dx * inv_r, 1.0)          # cos(atan2(dy, dx))

    # Sum of the three MLPs' output-layer biases (constant over the tile).
    s = s + b2_ref[0]

    # Rotation MLP: features (dist, sin, cos).  Unrolled hidden-unit loop keeps
    # only (tq, tk) maps live -- the H axis is never materialised.
    h_rot = b1r_ref.shape[0]
    for j in range(h_rot):
        h = (dist * w1r_ref[0 * h_rot + j]
             + sin_t * w1r_ref[1 * h_rot + j]
             + cos_t * w1r_ref[2 * h_rot + j]
             + b1r_ref[j])
        s = s + jnp.maximum(h, 0.0) * w2r_ref[j]

    # Translation + (algebraically folded) reflection MLPs: both reduce to
    # 2-feature (dx, dy) MLPs, fused into one loop of width 2*H.
    h_tr = b1t_ref.shape[0]
    for j in range(h_tr):
        h = dx * w1t_ref[0 * h_tr + j] + dy * w1t_ref[1 * h_tr + j] + b1t_ref[j]
        s = s + jnp.maximum(h, 0.0) * w2t_ref[j]

    # ---- online softmax over the key-tile axis ------------------------------
    m_prev = m_s[...]
    m_new = jnp.maximum(m_prev, jnp.max(s, axis=-1, keepdims=True))
    alpha = jnp.exp(m_prev - m_new)
    p = jnp.exp(s - m_new)
    l_s[...] = alpha * l_s[...] + jnp.sum(p, axis=-1, keepdims=True)
    acc_s[...] = alpha * acc_s[...] + lax.dot_general(
        p.astype(v.dtype), v, (((1,), (0,)), ((), ())),
        preferred_element_type=jnp.float32)
    m_s[...] = m_new

    @pl.when(ki == nk - 1)
    def _finalize():
        inv_l = pl.reciprocal(l_s[...], approx=False)
        o_ref[...] = (acc_s[...] * inv_l).astype(o_ref.dtype)


# ---------------------------------------------------------------------------
# Wrapper
# ---------------------------------------------------------------------------
def spatial_equivariant_attention(x, coords, params, *, matmul_dtype=jnp.float32):
    B, S, D = x.shape
    f32 = jnp.float32

    tq = _pick_seq_tile(S)
    tk = _pick_seq_tile(S)
    nq, nk = S // tq, S // tk

    # ---- parameter folding (once, in the wrapper) ---------------------------
    wqkv = jnp.concatenate(
        [params["wq"], params["wk"], params["wv"]], axis=1).astype(matmul_dtype)

    w1r_flat = params["w1_rot"].reshape(-1).astype(f32)               # (3H,)
    b1r = params["b1_rot"].reshape(-1).astype(f32)                    # (H,)
    w2r = params["w2_rot"].reshape(-1).astype(f32)                    # (H,)

    w1f = params["w1_reflect"]                                        # (4, H)
    # reflect features are [dx, dy, -dx, -dy]  ->  fold to a 2-feature MLP
    w1_refl_folded = jnp.stack([w1f[0] - w1f[2], w1f[1] - w1f[3]], axis=0)
    w1t = jnp.concatenate([params["w1_trans"], w1_refl_folded], axis=1)   # (2, 2H)
    w1t_flat = w1t.reshape(-1).astype(f32)                            # (4H,)
    b1t = jnp.concatenate([params["b1_trans"].reshape(-1),
                           params["b1_reflect"].reshape(-1)]).astype(f32)  # (2H,)
    w2t = jnp.concatenate([params["w2_trans"].reshape(-1),
                           params["w2_reflect"].reshape(-1)]).astype(f32)  # (2H,)
    b2_total = jnp.sum(params["b2_all"]).reshape(1).astype(f32)       # (1,)

    # Coordinates: query-side along sublanes, key-side along lanes.
    cq_x = coords[..., 0].reshape(B, S, 1).astype(f32)
    cq_y = coords[..., 1].reshape(B, S, 1).astype(f32)
    ck_x = coords[..., 0].reshape(B, 1, S).astype(f32)
    ck_y = coords[..., 1].reshape(B, 1, S).astype(f32)

    xm = x.astype(matmul_dtype)

    # ---- kernel 1: fused QKV projection -> (B, 3, S, D) ---------------------
    qkv = pl.pallas_call(
        _qkv_kernel,
        out_shape=jax.ShapeDtypeStruct((B, 3, S, D), matmul_dtype),
        grid=(B, nq),
        in_specs=[
            pl.BlockSpec((None, tq, D), lambda b, i: (b, i, 0)),      # x tile
            pl.BlockSpec((D, 3 * D), lambda b, i: (0, 0)),            # fused W
        ],
        out_specs=pl.BlockSpec((None, 3, tq, D), lambda b, i: (b, 0, i, 0)),
        compiler_params=pltpu.CompilerParams(
            dimension_semantics=("parallel", "parallel"),
            vmem_limit_bytes=_VMEM_LIMIT),
    )(xm, wqkv)

    # ---- kernel 2: tiled attention with geometry biases ---------------------
    out = pl.pallas_call(
        _attn_kernel,
        out_shape=jax.ShapeDtypeStruct((B, S, D), jnp.float32),
        grid=(B, nq, nk),
        in_specs=[
            pl.BlockSpec((None, None, tq, D), lambda b, qi, ki: (b, 0, qi, 0)),  # Q
            pl.BlockSpec((None, None, tk, D), lambda b, qi, ki: (b, 1, ki, 0)),  # K
            pl.BlockSpec((None, None, tk, D), lambda b, qi, ki: (b, 2, ki, 0)),  # V
            pl.BlockSpec((None, tq, 1), lambda b, qi, ki: (b, qi, 0)),           # cq_x
            pl.BlockSpec((None, tq, 1), lambda b, qi, ki: (b, qi, 0)),           # cq_y
            pl.BlockSpec((None, 1, tk), lambda b, qi, ki: (b, 0, ki)),           # ck_x
            pl.BlockSpec((None, 1, tk), lambda b, qi, ki: (b, 0, ki)),           # ck_y
            pl.BlockSpec(memory_space=pltpu.MemorySpace.SMEM),   # w1_rot flat (3H,)
            pl.BlockSpec(memory_space=pltpu.MemorySpace.SMEM),   # b1_rot (H,)
            pl.BlockSpec(memory_space=pltpu.MemorySpace.SMEM),   # w2_rot (H,)
            pl.BlockSpec(memory_space=pltpu.MemorySpace.SMEM),   # w1_tr flat (4H,)
            pl.BlockSpec(memory_space=pltpu.MemorySpace.SMEM),   # b1_tr (2H,)
            pl.BlockSpec(memory_space=pltpu.MemorySpace.SMEM),   # w2_tr (2H,)
            pl.BlockSpec(memory_space=pltpu.MemorySpace.SMEM),   # b2 sum (1,)
        ],
        out_specs=pl.BlockSpec((None, tq, D), lambda b, qi, ki: (b, qi, 0)),
        scratch_shapes=[
            pltpu.VMEM((tq, 1), jnp.float32),    # running max
            pltpu.VMEM((tq, 1), jnp.float32),    # running denom
            pltpu.VMEM((tq, D), jnp.float32),    # output accumulator
        ],
        compiler_params=pltpu.CompilerParams(
            dimension_semantics=("parallel", "parallel", "arbitrary"),
            vmem_limit_bytes=_VMEM_LIMIT),
    )(qkv, qkv, qkv, cq_x, cq_y, ck_x, ck_y,
      w1r_flat, b1r, w2r, w1t_flat, b1t, w2t, b2_total)

    return out


# ---------------------------------------------------------------------------
# Pure-JAX reference (mirrors the PyTorch forward exactly)
# ---------------------------------------------------------------------------
def reference(x, coords, params):
    B, S, D = x.shape
    Q = x @ params["wq"]
    K = x @ params["wk"]
    V = x @ params["wv"]
    scores = jnp.einsum("bid,bjd->bij", Q, K) / math.sqrt(D)

    rel = coords[:, None, :, :] - coords[:, :, None, :]      # coords_j - coords_i
    dx = rel[..., 0]
    dy = rel[..., 1]
    distance = jnp.sqrt(dx ** 2 + dy ** 2 + 1e-8)
    theta = jnp.arctan2(dy, dx)
    sin_t, cos_t = jnp.sin(theta), jnp.cos(theta)

    def mlp(feat, w1, b1, w2, b2):
        h = jnp.maximum(feat @ w1 + b1, 0.0)                 # (B,S,S,H)
        return jnp.einsum("bijh,h->bij", h, w2[0]) + b2

    psi_rot = mlp(jnp.stack([distance, sin_t, cos_t], -1),
                  params["w1_rot"], params["b1_rot"], params["w2_rot"],
                  params["b2_all"][0])
    psi_trans = mlp(jnp.stack([dx, dy], -1),
                    params["w1_trans"], params["b1_trans"], params["w2_trans"],
                    params["b2_all"][1])
    psi_reflect = mlp(jnp.stack([dx, dy, -dx, -dy], -1),
                      params["w1_reflect"], params["b1_reflect"],
                      params["w2_reflect"], params["b2_all"][2])

    scores = scores + psi_rot + psi_trans + psi_reflect
    attn = jax.nn.softmax(scores, axis=-1)
    return jnp.einsum("bij,bjd->bid", attn, V)


# ---------------------------------------------------------------------------
# Main
# ---------------------------------------------------------------------------
if __name__ == "__main__":
    B, S, D, H = 2, 8, 64, 32

    key = jax.random.PRNGKey(0)
    ks = jax.random.split(key, 20)
    g = lambda k, shape, s=0.1: (jax.random.normal(k, shape, dtype=jnp.float32) * s)

    params = {
        # q/k/v weights stored pre-transposed: y = x @ W  (== torch x @ W.T)
        "wq": g(ks[0], (D, D)),
        "wk": g(ks[1], (D, D)),
        "wv": g(ks[2], (D, D)),
        # rot MLP: Linear(3->H), ReLU, Linear(H->1)
        "w1_rot": g(ks[3], (3, H)),
        "b1_rot": g(ks[4], (1, H)),
        "w2_rot": g(ks[5], (1, H)),
        # trans MLP: Linear(2->H), ReLU, Linear(H->1)
        "w1_trans": g(ks[6], (2, H)),
        "b1_trans": g(ks[7], (1, H)),
        "w2_trans": g(ks[8], (1, H)),
        # reflect MLP: Linear(4->H), ReLU, Linear(H->1)
        "w1_reflect": g(ks[9], (4, H)),
        "b1_reflect": g(ks[10], (1, H)),
        "w2_reflect": g(ks[11], (1, H)),
        # layer-2 (output) biases of the three MLPs
        "b2_all": g(ks[12], (3,)),
    }

    x = jax.random.normal(ks[13], (B, S, D), dtype=jnp.float32)
    coords = jax.random.uniform(ks[14], (B, S, 2), dtype=jnp.float32) * 4.0

    ref = reference(x, coords, params)

    # f32 path (exact vs reference)
    out = spatial_equivariant_attention(x, coords, params)
    out = jax.block_until_ready(out)
    assert out.shape == (B, S, D)
    assert jnp.allclose(out, ref, atol=5e-3, rtol=5e-3), (
        f"max abs diff {jnp.max(jnp.abs(out - ref))}")

    # bf16-matmul path (MXU-optimized; f32 accumulation, f32 geometry/softmax)
    out_bf16 = spatial_equivariant_attention(
        x, coords, params, matmul_dtype=jnp.bfloat16)
    out_bf16 = jax.block_until_ready(out_bf16)
    assert bool(jnp.all(jnp.isfinite(out_bf16)))
    assert jnp.allclose(out_bf16, ref, atol=1e-1, rtol=1e-1), (
        f"bf16 max abs diff {jnp.max(jnp.abs(out_bf16 - ref))}")

    print("KERNEL_OK")
</pallas_src>

<mosaic_0001>
module attributes {stable_mosaic.version = 11 : i64} {
  func.func @_qkv_kernel(%arg0: i32, %arg1: i32, %arg2: memref<1x8x64xf32, #tpu.memory_space<vmem>>, %arg3: memref<64x192xf32, #tpu.memory_space<vmem>>, %arg4: memref<1x3x8x64xf32, #tpu.memory_space<vmem>>) attributes {dimension_semantics = [#tpu.dimension_semantics<parallel>, #tpu.dimension_semantics<parallel>], iteration_bounds = array<i64: 2, 1>, scalar_prefetch = 0 : i64, scratch_operands = 0 : i64, tpu.core_type = #tpu.core_type<tc>, window_params = [{transform_indices = @transform_0, window_bounds = array<i64: 1, 8, 64>}, {pipeline_mode = #tpu.pipeline_mode<synchronous>, transform_indices = @transform_1, window_bounds = array<i64: 64, 192>}, {transform_indices = @transform_2, window_bounds = array<i64: 1, 3, 8, 64>}]} {
    %c0 = arith.constant 0 : index
    %c0_0 = arith.constant 0 : index
    %c0_1 = arith.constant 0 : index
    %0 = vector.load %arg2[%c0, %c0_0, %c0_1] : memref<1x8x64xf32, #tpu.memory_space<vmem>>, vector<1x8x64xf32>
    %1 = vector.shape_cast %0 : vector<1x8x64xf32> to vector<8x64xf32>
    %c0_2 = arith.constant 0 : index
    %c0_3 = arith.constant 0 : index
    %2 = vector.load %arg3[%c0_2, %c0_3] : memref<64x192xf32, #tpu.memory_space<vmem>>, vector<64x192xf32>
    %cst = arith.constant dense<0.000000e+00> : vector<8x192xf32>
    %3 = tpu.matmul %1, %2, %cst {dimension_numbers = #tpu.dot_dimension_numbers<[1], [0], [0], [1], [0, 0, 1, 1], [], []>} : vector<8x64xf32>, vector<64x192xf32>, vector<8x192xf32> -> vector<8x192xf32>
    %4 = vector.extract_strided_slice %3 {offsets = [0, 0], sizes = [8, 64], strides = [1, 1]} : vector<8x192xf32> to vector<8x64xf32>
    %c0_4 = arith.constant 0 : index
    %c0_5 = arith.constant 0 : index
    %c0_6 = arith.constant 0 : index
    %c0_7 = arith.constant 0 : index
    %5 = vector.load %arg4[%c0_4, %c0_5, %c0_6, %c0_7] : memref<1x3x8x64xf32, #tpu.memory_space<vmem>>, vector<1x1x8x64xf32>
    %6 = vector.shape_cast %5 : vector<1x1x8x64xf32> to vector<8x64xf32>
    %7 = vector.shape_cast %4 : vector<8x64xf32> to vector<1x1x8x64xf32>
    tpu.vector_store %arg4[%c0_4, %c0_5, %c0_6, %c0_7], %7 {strides = array<i32>} : memref<1x3x8x64xf32, #tpu.memory_space<vmem>>, vector<1x1x8x64xf32>,
    %8 = vector.extract_strided_slice %3 {offsets = [0, 64], sizes = [8, 64], strides = [1, 1]} : vector<8x192xf32> to vector<8x64xf32>
    %c0_8 = arith.constant 0 : index
    %c1 = arith.constant 1 : index
    %c0_9 = arith.constant 0 : index
    %c0_10 = arith.constant 0 : index
    %9 = vector.load %arg4[%c0_8, %c1, %c0_9, %c0_10] : memref<1x3x8x64xf32, #tpu.memory_space<vmem>>, vector<1x1x8x64xf32>
    %10 = vector.shape_cast %9 : vector<1x1x8x64xf32> to vector<8x64xf32>
    %11 = vector.shape_cast %8 : vector<8x64xf32> to vector<1x1x8x64xf32>
    tpu.vector_store %arg4[%c0_8, %c1, %c0_9, %c0_10], %11 {strides = array<i32>} : memref<1x3x8x64xf32, #tpu.memory_space<vmem>>, vector<1x1x8x64xf32>,
    %12 = vector.extract_strided_slice %3 {offsets = [0, 128], sizes = [8, 64], strides = [1, 1]} : vector<8x192xf32> to vector<8x64xf32>
    %c0_11 = arith.constant 0 : index
    %c2 = arith.constant 2 : index
    %c0_12 = arith.constant 0 : index
    %c0_13 = arith.constant 0 : index
    %13 = vector.load %arg4[%c0_11, %c2, %c0_12, %c0_13] : memref<1x3x8x64xf32, #tpu.memory_space<vmem>>, vector<1x1x8x64xf32>
    %14 = vector.shape_cast %13 : vector<1x1x8x64xf32> to vector<8x64xf32>
    %15 = vector.shape_cast %12 : vector<8x64xf32> to vector<1x1x8x64xf32>
    tpu.vector_store %arg4[%c0_11, %c2, %c0_12, %c0_13], %15 {strides = array<i32>} : memref<1x3x8x64xf32, #tpu.memory_space<vmem>>, vector<1x1x8x64xf32>,
    return
  }
  func.func @transform_0(%arg0: i32, %arg1: i32) -> (i32, i32, i32) {
    %c0_i32 = arith.constant 0 : i32
    %c0_i32_0 = arith.constant 0 : i32
    return %arg0, %arg1, %c0_i32 : i32, i32, i32
  }
  func.func @transform_1(%arg0: i32, %arg1: i32) -> (i32, i32) {
    %c0_i32 = arith.constant 0 : i32
    %c0_i32_0 = arith.constant 0 : i32
    %c0_i32_1 = arith.constant 0 : i32
    return %c0_i32, %c0_i32_0 : i32, i32
  }
  func.func @transform_2(%arg0: i32, %arg1: i32) -> (i32, i32, i32, i32) {
    %c0_i32 = arith.constant 0 : i32
    %c0_i32_0 = arith.constant 0 : i32
    %c0_i32_1 = arith.constant 0 : i32
    return %arg0, %c0_i32, %arg1, %c0_i32_0 : i32, i32, i32, i32
  }
}

</mosaic_0001>

<bundles_post_ra>
// kernel: tpu_custom_call.1
= control target key start
LH: loop header
LB: loop body
LE: loop exit
PB: predicated region body
PF: predicated region fallthrough
CT: control target
= control target key end

     0   :  { %7 = vsyncpa [#allocation3], 0  ;;  %s851_s0 = inlined_call_operand.hbm [shape: f32[2,8,64], index: 0, kind: input, shape index: {}]   ;;  %s852_s1 = inlined_call_operand.hbm [shape: f32[64,192], index: 1, kind: input, shape index: {}]   ;;  %s853_s2 = inlined_call_operand.hbm [shape: f32[2,3,8,64], index: 2, kind: output, shape index: {}]  }
   0x1   :  { %9 = vsyncpa [#allocation3 + $0x1], 0 }
   0x2   :  { %10 = vsyncpa [#allocation6], 0 }
   0x3   :  { %11 = vsyncpa [#allocation4], 0 }
   0x4   :  { %13 = vsyncpa [#allocation4 + $0x1], 0  ;;  %s662_s9 = smov 0   ;;  %s664_s10 = smov 0  }
   0x5   :  { %s666_s11 = smov 0   ;;  %s668_s12 = smov 0  }
   0x6   :  { %s670_s13 = smov 0   ;;  %s672_s14 = smov 0  }
   0x7 LB: > { %s401_s15 = sadd.s32 4294967295, %s636_s14   ;;  %s402_s16 = sadd.s32 4294967294, %s636_s14   ;;  %s636_s14 = sphi %s672_s14, %s19_s14   ;;  %s632_s13 = sphi %s670_s13, %s871_s13   ;;  %s628_s12 = sphi %s668_s12, %s870_s12   ;;  %s624_s11 = sphi %s666_s11, %s869_s11   ;;  %s620_s10 = sphi %s664_s10, %s868_s10   ;;  %s616_s9 = sphi %s662_s9, %s867_s9  }
   0x8   : > { %p53_p0 = scmp.ne.s32.totalorder %s620_s10, %s616_s9  ;;  %p696_p1 = scmp.eq.s32.totalorder %s401_s15, 0 }
   0x9   : > { %p700_p2 = scmp.eq.s32.totalorder %s401_s15, 1  ;;  %p106_p3 = scmp.eq.s32.totalorder %s402_s16, 1 }
   0xa   : > { %p706_p4 = por %p696_p1, %p53_p0  ;;  %p403_p5 = scmp.ge.s32.totalorder %s636_s14, 1 }
   0xb   : > { %p711_p6 = por %p106_p3, %p53_p0  ;;  %p113_p7 = scmp.lt.s32.totalorder %s636_s14, 3 }
   0xc   : > { %s857_s19 = scalar_select %p706_p4, 1, 0 }
   0xd   : > { %s858_s20 = scalar_select %p711_p6, 1, 0 }
   0xe   : > { %p716_p8 = pnand %p403_p5, %p113_p7  ;;  %s638_s22 = smov [#allocation5]  }
   0xf   : > { %s125_s23 = sshll.u32 %s638_s22, 4  ;;  %s31_s25 = sadd.s32 1, %s632_s13  ;;  %s126_s23 = int_to_ptr.vmem [resolvable:$true] %s125_s23 }
  0x10   : > { %p427_p9 = pneg %p716_p8  ;;  %s509_s26 = scalar_lea.vmem %s126_s23, 2048 }
  0x11   : > { %p510_p13 = scmp.ne.s32.totalorder %s126_s23, %s509_s26  ;;  %p517_p5 = scmp.lt.s32.totalorder %s126_s23, %s126_s23 }
  0x12   : > { %p725_p11 = pnand %p427_p9, %p696_p1  ;;  %p518_p7 = scmp.lt.s32.totalorder %s509_s26, %s509_s26 }
  0x14   : > { %p500_p12 = pneg %p725_p11  ;;  %p519_p6 = por %p518_p7, %p517_p5 }
  0x16   : > { %p512_p0 = pnand %p510_p13, %p500_p12 }
  0x18   : > { %p513_p3 = pneg %p512_p0 }
  0x1a   : > { %p520_p4 = pnand %p519_p6, %p513_p3 }
  0x1c   : > { %523 = shalt.err (!%p520_p4)
}
  0x1d   : > { %s639_s27 = smov 256   ;;  %s640_s28 = smov 16  }
  0x1e   : > { %430 = dma.hbm_to_vmem [thread:$0]  (!%p725_p11), %s852_s1, 2048, %s126_s23, [#allocation6], %s639_s27, %s639_s27, %s640_s28  }
  0x1f   : > { %p33_p6 = scmp.ge.s32.totalorder %s31_s25, 2  ;;  %s40_s3 = sadd.s32 1, %s624_s11 }
  0x20   : > { %p47_p4 = scmp.ne.s32.totalorder %s624_s11, %s620_s10  ;;  %p48_p9 = scmp.eq.s32.totalorder %s636_s14, 0 }
  0x21   : > { %s873_s25 = smov (%p33_p6, %s31_s25), 0  ;;  %p440_p0 = scmp.lt.s32.totalorder %s636_s14, 2 }
  0x22   : > { %p743_p12 = por %p48_p9, %p47_p4  ;;  %p749_p13 = por %p700_p2, %p47_p4 }
  0x23   : > { %s35_s6 = ssub.s32 %s632_s13, %s873_s25  ;;  %s139_s7 = sand.u32 1, %s624_s11  }
  0x24   : > { %p38_p11 = scmp.eq.s32.totalorder %s35_s6, 0  ;;  %s406_s8 = sshll.u32 %s139_s7, 3 }
  0x25   : > { %s407_s16 = sshll.u32 %s632_s13, 7  ;;  %s143_s26 = scalar_lea.vmem [#allocation2], %s406_s8 }
  0x26   : > { %s758_s15 = scalar_select %p38_p11, %s624_s11, %s40_s3  }
  0x27   : > { %s149_s24 = scalar_lea.hbm %s851_s0, %s407_s16  ;;  %s151_s27 = sshll.u32 %s143_s26, 4  ;;  %s152_s27 = int_to_ptr.vmem [resolvable:$true] %s151_s27 }
  0x28   : > { %p766_p2 = pnand %p440_p0, %p743_p12  ;;  %s140_s28 = scalar_lea.sflag [#allocation3], %s139_s7 }
  0x29   : > { %s537_s29 = scalar_lea.vmem %s152_s27, 128  ;;  %s641_s30 = smov [#allocation2]  }
  0x2a   : > { %p526_p3 = pneg %p766_p2  ;;  %p538_p5 = scmp.ne.s32.totalorder %s152_s27, %s537_s29 }
  0x2b   : > { %s542_s3 = sshll.u32 %s641_s30, 4  ;;  %s543_s3 = int_to_ptr.vmem [resolvable:$false] %s542_s3 }
  0x2c   : > { %p540_p7 = pnand %p538_p5, %p526_p3  ;;  %s544_s6 = scalar_lea.vmem %s543_s3, 256 }
  0x2d   : > { %p545_p4 = scmp.lt.s32.totalorder %s152_s27, %s543_s3  ;;  %p546_p9 = scmp.lt.s32.totalorder %s544_s6, %s537_s29 }
  0x2e   : > { %p541_p6 = pneg %p540_p7 }
  0x2f   : > { %p547_p11 = por %p546_p9, %p545_p4 }
  0x31   : > { %p548_p10 = pnand %p547_p11, %p541_p6 }
  0x33   : > { %551 = shalt.err (!%p548_p10)
}
  0x34   : > { %434 = dma.hbm_to_vmem [thread:$0]  (!%p766_p2), %s149_s24, 128, %s152_s27, %s140_s28  }
  0x35   : > { %160 = sbr.rel (%p716_p8) target bundleno = 400 (0x190), region = 28  ;;  %s777_s4 = sand.u32 (!%p716_p8), 1, %s620_s10  }
  0x36   : > { %s409_s7 = sshll.u32 (!%p716_p8), %s777_s4, 3  ;;  %s163_s8 = scalar_lea.sflag (!%p716_p8), [#allocation3], %s777_s4 }
  0x37   : > { %s781_s16 = scalar_lea.vmem (!%p716_p8), [#allocation2], %s409_s7  ;;  %p864_p12 = scmp.ne.s32.totalorder (!%p716_p8), %s857_s19, 0 }
  0x3a   : > { %603 = dma.done.wait (%p864_p12), %s163_s8, 128  }
  0x3b   : > { %605 = vsyncadd (%p864_p12), %s163_s8, 4294967168 }
  0x3c   : > { %607 = dma.done.wait (%p696_p1), [#allocation6], 2048  }
  0x3d   : > { %609 = vsyncadd (%p696_p1), [#allocation6], 4294965248  ;;  %v642_v0 = vmov 0.0   ;;  %v207_v1 = vld [vmem:[#allocation5 + $0x78] sm:$0xff]  ;;  %v206_v2 = vld [vmem:[#allocation5 + $0x70] sm:$0xff]  ;;  %vm208_vm0 = vcmask 523264  }
  0x3e   : > { %276 = vmatprep.mubr.f32.mxu0 %v642_v0  ;;  %v205_v3 = vld [vmem:[#allocation5 + $0x68] sm:$0xff]  ;;  %228 = vmatprep.subr.mxu0 %v207_v1  ;;  %v204_v4 = vld [vmem:[#allocation5 + $0x60] sm:$0xff]  ;;  %v203_v5 = vld [vmem:[#allocation5 + $0x58] sm:$0xff]  ;;  %s417_s17 = smul.u32 24, %s777_s4  ;;  %s643_s21 = smov 64  }
  0x3f   : > { %229 = vmatpush1.msra.mxu0 %v206_v2  ;;  %v202_v6 = vld [vmem:[#allocation5 + $0x50] sm:$0xff]  ;;  %v201_v7 = vld [vmem:[#allocation5 + $0x48] sm:$0xff]  ;;  %v200_v8 = vld [vmem:[#allocation5 + $0x40] sm:$0xff]  ;;  %s418_s23 = smul.u32 384, %s628_s12  ;;  %s293_s18 = scalar_lea.sflag [#allocation4], %s777_s4 }
  0x40   : > { %230 = vmatprep.subr.mxu0 %v205_v3  ;;  %v199_v9 = vld [vmem:[#allocation5 + $0x38] sm:$0xff]  ;;  %v198_v10 = vld [vmem:[#allocation5 + $0x30] sm:$0xff]  ;;  %v197_v11 = vld [vmem:[#allocation5 + $0x28] sm:$0xff]  ;;  %s190_s19 = scalar_lea.vmem [#allocation7], %s417_s17  ;;  %s644_s12 = smov [#allocation7]  }
  0x41   : > { %231 = vmatpush1.msra.mxu0 %v204_v4  ;;  %v196_v12 = vld [vmem:[#allocation5 + $0x20] sm:$0xff]  ;;  %v195_v13 = vld [vmem:[#allocation5 + $0x18] sm:$0xff]  ;;  %v194_v14 = vld [vmem:[#allocation5 + $0x10] sm:$0xff]  ;;  %s307_s22 = sshll.u32 %s190_s19, 4  ;;  %s802_s27 = scalar_lea.hbm %s853_s2, %s418_s23  ;;  %s797_s22 = int_to_ptr.vmem [resolvable:$true] %s307_s22 }
  0x42   : > { %232 = vmatprep.subr.mxu0 %v203_v5  ;;  %v193_v15 = vld [vmem:[#allocation5 + $0x8] sm:$0xff]  ;;  %v192_v16 = vld [vmem:[#allocation5] sm:$0xff]  ;;  %v191_v17 = vld [vmem:[%s781_s16] sm:$0xff]  ;;  %s552_s28 = scalar_lea.vmem %s797_s22, 384  ;;  %s556_s29 = sshll.u32 %s644_s12, 4  ;;  %s557_s29 = int_to_ptr.vmem [resolvable:$false] %s556_s29 }
  0x43   : > { %233 = vmatpush1.msra.mxu0 %v202_v6  ;;  %p553_p1 = scmp.ne.s32.totalorder %s797_s22, %s552_s28  ;;  %s558_s30 = scalar_lea.vmem %s557_s29, 768 }
  0x44   : > { %234 = vmatprep.subr.mxu0 %v201_v7  ;;  %p559_p0 = scmp.lt.s32.totalorder %s797_s22, %s557_s29  ;;  %p560_p2 = scmp.lt.s32.totalorder %s558_s30, %s552_s28 }
  0x45   : > { %235 = vmatpush1.msra.mxu0 %v200_v8  ;;  %p554_p8 = pnand %p553_p1, %p749_p13 }
  0x46   : > { %236 = vmatprep.subr.mxu0 %v199_v9  ;;  %p561_p3 = por %p560_p2, %p559_p0 }
  0x47   : > { %237 = vmatpush1.msra.mxu0 %v198_v10  ;;  %p555_p10 = pneg %p554_p8 }
  0x48   : > { %238 = vmatprep.subr.mxu0 %v197_v11 }
  0x49   : > { %239 = vmatpush1.msra.mxu0 %v196_v12  ;;  %p562_p5 = pnand %p561_p3, %p555_p10 }
  0x4a   : > { %240 = vmatprep.subr.mxu0 %v195_v13 }
  0x4b   : > { %241 = vmatpush1.msra.mxu0 %v194_v14 }
  0x4c   : > { %242 = vmatprep.subr.mxu0 %v193_v15 }
  0x4d   : > { %243 = vmatpush1.msra.mxu0 %v192_v16 }
  0x4e   : > { %411 = vmatmul.mubr.msk.f32.vlgmr.msra.gmra.mxu0 %vm208_vm0, %v191_v17 }
 0x10e   : > { %v278_v18 = vpop.f32.mrf.mxu0 }
 0x10f   : > { %283 = vst.msk [vmem:[%s190_s19] sm:$0xff] %vm208_vm0, %v278_v18  ;;  %285 = vrot.lane.b32.xlu0 %v278_v18, %s643_s21 }
 0x110   : > { %v280_v19 = vpop.f32.mrf.mxu0 }
 0x111   : > { %413 = vst.msk [vmem:[%s190_s19 + $0x10] sm:$0xff] %vm208_vm0, %v280_v19 }
 0x181   : > { %v286_v20 = vpop.permute.xlu0 %285 }
 0x182   : > { %412 = vst.msk [vmem:[%s190_s19 + $0x8] sm:$0xff] %vm208_vm0, %v286_v20 }
 0x183   : > { %565 = shalt.err (!%p562_p5)
}
 0x184   : > { %s566_s3 = scalar_lea.hbm %s802_s27, 384  ;;  %s570_s8 = scalar_lea.hbm %s853_s2, 768 }
 0x185   : > { %p567_p7 = scmp.ne.s32.totalorder %s802_s27, %s566_s3  ;;  %p571_p9 = scmp.lt.s32.totalorder %s802_s27, %s853_s2 }
 0x186   : > { %p572_p11 = scmp.lt.s32.totalorder %s570_s8, %s566_s3 }
 0x187   : > { %p568_p6 = pnand %p567_p7, %p749_p13 }
 0x188   : > { %p573_p12 = por %p572_p11, %p571_p9 }
 0x189   : > { %p569_p4 = pneg %p568_p6 }
 0x18b   : > { %p574_p1 = pnand %p573_p12, %p569_p4 }
 0x18d   : > { %577 = shalt.err (!%p574_p1)
}
 0x18e   : > { %s645_s19 = smov 128   ;;  %s646_s21 = smov 8  }
 0x18f   : > { %425 = dma.vmem_to_hbm [thread:$0]  (%p749_p13), %s797_s22, 384, %s802_s27, %s293_s18, %s645_s19, %s645_s19, %s646_s21  }
 0x190 PF: > { %s322_s23 = sand.u32 1, %s616_s9   ;;  %p865_p8 = scmp.ne.s32.totalorder %s858_s20, 0 }
 0x191   : > { %p866_p10 = scmp.ge.s32.totalorder %s636_s14, 2  ;;  %s323_s24 = scalar_lea.sflag [#allocation4], %s322_s23 }
 0x193   : > { %p436_p0 = pnand %p866_p10, %p865_p8 }
 0x195   : > { %p437_p2 = pneg %p436_p0 }
 0x197   : > { %611 = dma.done.wait (%p437_p2), %s323_s24, 384  }
 0x198   : > { %613 = vsyncadd (%p437_p2), %s323_s24, 4294966912  ;;  %s19_s14 = sadd.s32 1, %s636_s14   ;;  %s867_s9 = smov %s620_s10 }
 0x199   : > { %p16_p3 = scmp.ge.s32.totalorder %s19_s14, 4   ;;  %s868_s10 = smov %s624_s11 }
 0x19a   : > { %s869_s11 = smov %s758_s15  ;;  %s870_s12 = smov %s632_s13 }
 0x19b   : > { %s871_s13 = smov %s873_s25  ;;  %18 = sbr.rel (!%p16_p3) target bundleno = 7 (0x7), region = 79 }
 0x1a0   :  { %328 = vsyncpa [#allocation3], 1 }
 0x1a1   :  { %330 = vsyncpa [#allocation3 + $0x1], 1 }
 0x1a2   :  { %331 = vsyncpa [#allocation6], 1 }
 0x1a3   :  { %332 = vsyncpa [#allocation4], 1 }
 0x1a4   :  { %334 = vsyncpa [#allocation4 + $0x1], 1 }

</bundles_post_ra>
